<compile_context>
chip_gen: v6e
topology: v6e:2x2x1
jax: 0.10.0
libtpu: 0.0.40
codegen_flags: <defaults>
</compile_context>

<pallas_src>
import math

import jax
import jax.numpy as jnp
from jax.experimental import pallas as pl
from jax.experimental.pallas import tpu as pltpu


LANE = 128


def _round_up(n: int, m: int) -> int:
    return ((n + m - 1) // m) * m


def _pad_2d(a, rows, cols):
    r, c = a.shape
    if r == rows and c == cols:
        return a
    return jnp.zeros((rows, cols), a.dtype).at[:r, :c].set(a)


def _make_mlp_kernel(n_layers, relu_flags, compute_dtype, out_dtype):
    """Builds a fused MLP kernel over (x, w1, b1, ..., wN, bN, out) refs."""

    def kernel(*refs):
        x_ref = refs[0]
        o_ref = refs[-1]
        h = x_ref[...]
        for i in range(n_layers):
            w = refs[1 + 2 * i][...]          # bf16 weights -> consumed by MXU directly
            b = refs[2 + 2 * i][...]          # f32 bias, (1, out) broadcasts over rows
            h = jnp.dot(h.astype(compute_dtype), w,
                        preferred_element_type=jnp.float32) + b
            if relu_flags[i]:
                h = jnp.maximum(h, 0.0)
        o_ref[...] = h.astype(out_dtype)

    return kernel


def mlp_decoder_forward(x, weights, biases, relu_flags, *, batch_tile=128):
    """Runs the decoder MLP as a single fused Pallas kernel, tiled over batch.

    x:        [B, latent_size]              (any float dtype; output keeps x.dtype)
    weights:  list of [d_in_i, d_out_i]     (bf16 recommended -> fast MXU path)
    biases:   list of [1, d_out_i]          (f32)
    """
    B, d_in = x.shape
    n_layers = len(weights)
    d_out = weights[-1].shape[1]

    # --- Zero-pad feature dims to 128-lane multiples (numerically exact).
    weights_p, biases_p = [], []
    for w, b in zip(weights, biases):
        dinp = _round_up(w.shape[0], LANE)
        doutp = _round_up(w.shape[1], LANE)
        weights_p.append(_pad_2d(w, dinp, doutp))
        biases_p.append(_pad_2d(b, 1, doutp))
    d_in_p = weights_p[0].shape[0]
    d_out_p = weights_p[-1].shape[1]

    # --- Zero-pad batch to a tile multiple; padded rows are sliced off below.
    bt = max(8, int(batch_tile))
    B_p = _round_up(B, bt)
    x_p = _pad_2d(x, B_p, d_in_p)

    compute_dtype = weights_p[0].dtype
    kernel = _make_mlp_kernel(n_layers, tuple(relu_flags), compute_dtype, x.dtype)

    # x / out: tiled over the batch axis; weights & biases: full blocks,
    # resident for every grid step (constant index_map -> no re-DMA).
    in_specs = [pl.BlockSpec((bt, d_in_p), lambda i: (i, 0))]
    flat_params = []
    for w, b in zip(weights_p, biases_p):
        in_specs.append(pl.BlockSpec(w.shape, lambda i: (0, 0)))
        in_specs.append(pl.BlockSpec(b.shape, lambda i: (0, 0)))
        flat_params.extend([w, b])
    out_spec = pl.BlockSpec((bt, d_out_p), lambda i: (i, 0))

    param_bytes = sum(int(p.size) * p.dtype.itemsize for p in flat_params)
    cost = pl.CostEstimate(
        flops=int(2 * B_p * sum(int(w.shape[0]) * int(w.shape[1]) for w in weights_p)),
        transcendentals=0,
        bytes_accessed=int(x_p.size) * x_p.dtype.itemsize
        + param_bytes
        + int(B_p * d_out_p) * jnp.dtype(x.dtype).itemsize,
    )

    out = pl.pallas_call(
        kernel,
        out_shape=jax.ShapeDtypeStruct((B_p, d_out_p), x.dtype),
        grid_spec=pltpu.PrefetchScalarGridSpec(
            num_scalar_prefetch=0,
            grid=(B_p // bt,),
            in_specs=in_specs,
            out_specs=out_spec,
        ),
        compiler_params=pltpu.CompilerParams(
            dimension_semantics=("parallel",),
        ),
        cost_estimate=cost,
    )(x_p, *flat_params)

    if B_p != B or d_out_p != d_out:
        out = out[:B, :d_out]
    return out


def init_linear_params(key, d_in, d_out, weight_dtype=jnp.bfloat16):
    """Matches torch.nn.Linear default init (U[-1/sqrt(fan_in), 1/sqrt(fan_in)]).

    Weights stored in bf16 (fast MXU operand format); biases kept in f32.
    """
    kw, kb = jax.random.split(key)
    bound = 1.0 / math.sqrt(d_in)
    w = jax.random.uniform(kw, (d_in, d_out), jnp.float32, minval=-bound, maxval=bound)
    b = jax.random.uniform(kb, (1, d_out), jnp.float32, minval=-bound, maxval=bound)
    return w.astype(weight_dtype), b


def build_decoder_params(train_params, key, weight_dtype=jnp.bfloat16):
    """Mirrors MLPDecoder.__init__: reverse fc_units, append input_size."""
    fc_units = list(train_params["fc_units"])
    fc_units.reverse()
    layer_sizes = [train_params["latent_size"]] + fc_units + [train_params["input_size"]]
    weights, biases, relu_flags = [], [], []
    n_layers = len(layer_sizes) - 1
    keys = jax.random.split(key, n_layers)
    for i in range(n_layers):
        w, b = init_linear_params(keys[i], layer_sizes[i], layer_sizes[i + 1], weight_dtype)
        weights.append(w)
        biases.append(b)
        relu_flags.append(i < n_layers - 1)  # ReLU on hidden layers only
    return weights, biases, relu_flags


def reference_forward(x, weights, biases, relu_flags):
    """Pure-JAX reference with the same precision policy as the kernel
    (bf16 matmul operands, f32 accumulation, f32 bias)."""
    h = x
    for w, b, r in zip(weights, biases, relu_flags):
        h = jnp.dot(h.astype(w.dtype), w, preferred_element_type=jnp.float32)
        h = h + b.astype(jnp.float32)
        if r:
            h = jnp.maximum(h, 0.0)
    return h.astype(x.dtype)


if __name__ == "__main__":
    train_params = {
        "latent_size": 32,
        "fc_units": [64, 128],      # encoder order; decoder reverses -> [128, 64]
        "fc_layers": 3,
        "fc_activation": "relu",
        "input_size": 256,
    }

    key = jax.random.PRNGKey(0)
    kx, kxs, kp = jax.random.split(key, 3)

    weights, biases, relu_flags = build_decoder_params(train_params, kp)

    # Main case: batch large enough for a >=2-step grid (both v7x TCs busy).
    batch = 256
    x = jax.random.normal(kx, (batch, train_params["latent_size"]), jnp.float32)
    out = jax.block_until_ready(mlp_decoder_forward(x, weights, biases, relu_flags))
    ref = reference_forward(x, weights, biases, relu_flags)
    assert out.shape == (batch, train_params["input_size"])
    assert jnp.allclose(out, ref, atol=2e-2, rtol=2e-2), float(jnp.max(jnp.abs(out - ref)))

    # Small batch exercises the batch-padding path.
    x_small = jax.random.normal(kxs, (8, train_params["latent_size"]), jnp.float32)
    out_small = jax.block_until_ready(
        mlp_decoder_forward(x_small, weights, biases, relu_flags)
    )
    ref_small = reference_forward(x_small, weights, biases, relu_flags)
    assert out_small.shape == (8, train_params["input_size"])
    assert jnp.allclose(out_small, ref_small, atol=2e-2, rtol=2e-2)

    print("KERNEL_OK")
</pallas_src>

<mosaic_0001>
module attributes {stable_mosaic.version = 11 : i64} {
  func.func @kernel(%arg0: i32, %arg1: memref<128x128xf32, #tpu.memory_space<vmem>>, %arg2: memref<128x128xbf16, #tpu.memory_space<vmem>>, %arg3: memref<1x128xf32, #tpu.memory_space<vmem>>, %arg4: memref<128x128xbf16, #tpu.memory_space<vmem>>, %arg5: memref<1x128xf32, #tpu.memory_space<vmem>>, %arg6: memref<128x256xbf16, #tpu.memory_space<vmem>>, %arg7: memref<1x256xf32, #tpu.memory_space<vmem>>, %arg8: memref<128x256xf32, #tpu.memory_space<vmem>>) attributes {dimension_semantics = [#tpu.dimension_semantics<parallel>], iteration_bounds = array<i64: 2>, scalar_prefetch = 0 : i64, scratch_operands = 0 : i64, tpu.core_type = #tpu.core_type<tc>, window_params = [{transform_indices = @transform_0, window_bounds = array<i64: 128, 128>}, {pipeline_mode = #tpu.pipeline_mode<synchronous>, transform_indices = @transform_1, window_bounds = array<i64: 128, 128>}, {pipeline_mode = #tpu.pipeline_mode<synchronous>, transform_indices = @transform_2, window_bounds = array<i64: 1, 128>}, {pipeline_mode = #tpu.pipeline_mode<synchronous>, transform_indices = @transform_3, window_bounds = array<i64: 128, 128>}, {pipeline_mode = #tpu.pipeline_mode<synchronous>, transform_indices = @transform_4, window_bounds = array<i64: 1, 128>}, {pipeline_mode = #tpu.pipeline_mode<synchronous>, transform_indices = @transform_5, window_bounds = array<i64: 128, 256>}, {pipeline_mode = #tpu.pipeline_mode<synchronous>, transform_indices = @transform_6, window_bounds = array<i64: 1, 256>}, {transform_indices = @transform_7, window_bounds = array<i64: 128, 256>}]} {
    %c0 = arith.constant 0 : index
    %c0_0 = arith.constant 0 : index
    %0 = vector.load %arg1[%c0, %c0_0] : memref<128x128xf32, #tpu.memory_space<vmem>>, vector<128x128xf32>
    %c0_1 = arith.constant 0 : index
    %c0_2 = arith.constant 0 : index
    %1 = vector.load %arg2[%c0_1, %c0_2] : memref<128x128xbf16, #tpu.memory_space<vmem>>, vector<128x128xbf16>
    %c0_3 = arith.constant 0 : index
    %c0_4 = arith.constant 0 : index
    %2 = vector.load %arg3[%c0_3, %c0_4] : memref<1x128xf32, #tpu.memory_space<vmem>>, vector<1x128xf32>
    %3 = arith.truncf %0 : vector<128x128xf32> to vector<128x128xbf16>
    %cst = arith.constant dense<0.000000e+00> : vector<128x128xf32>
    %4 = tpu.matmul %3, %1, %cst {dimension_numbers = #tpu.dot_dimension_numbers<[1], [0], [0], [1], [0, 0, 1, 1], [], []>} : vector<128x128xbf16>, vector<128x128xbf16>, vector<128x128xf32> -> vector<128x128xf32>
    %5 = vector.broadcast %2 : vector<1x128xf32> to vector<128x128xf32>
    %6 = arith.addf %4, %5 : vector<128x128xf32>
    %cst_5 = arith.constant 0.000000e+00 : f32
    %7 = vector.broadcast %cst_5 : f32 to vector<128x128xf32>
    %8 = arith.maximumf %6, %7 : vector<128x128xf32>
    %c0_6 = arith.constant 0 : index
    %c0_7 = arith.constant 0 : index
    %9 = vector.load %arg4[%c0_6, %c0_7] : memref<128x128xbf16, #tpu.memory_space<vmem>>, vector<128x128xbf16>
    %c0_8 = arith.constant 0 : index
    %c0_9 = arith.constant 0 : index
    %10 = vector.load %arg5[%c0_8, %c0_9] : memref<1x128xf32, #tpu.memory_space<vmem>>, vector<1x128xf32>
    %11 = arith.truncf %8 : vector<128x128xf32> to vector<128x128xbf16>
    %cst_10 = arith.constant dense<0.000000e+00> : vector<128x128xf32>
    %12 = tpu.matmul %11, %9, %cst_10 {dimension_numbers = #tpu.dot_dimension_numbers<[1], [0], [0], [1], [0, 0, 1, 1], [], []>} : vector<128x128xbf16>, vector<128x128xbf16>, vector<128x128xf32> -> vector<128x128xf32>
    %13 = vector.broadcast %10 : vector<1x128xf32> to vector<128x128xf32>
    %14 = arith.addf %12, %13 : vector<128x128xf32>
    %cst_11 = arith.constant 0.000000e+00 : f32
    %15 = vector.broadcast %cst_11 : f32 to vector<128x128xf32>
    %16 = arith.maximumf %14, %15 : vector<128x128xf32>
    %c0_12 = arith.constant 0 : index
    %c0_13 = arith.constant 0 : index
    %17 = vector.load %arg6[%c0_12, %c0_13] : memref<128x256xbf16, #tpu.memory_space<vmem>>, vector<128x256xbf16>
    %c0_14 = arith.constant 0 : index
    %c0_15 = arith.constant 0 : index
    %18 = vector.load %arg7[%c0_14, %c0_15] : memref<1x256xf32, #tpu.memory_space<vmem>>, vector<1x256xf32>
    %19 = arith.truncf %16 : vector<128x128xf32> to vector<128x128xbf16>
    %cst_16 = arith.constant dense<0.000000e+00> : vector<128x256xf32>
    %20 = tpu.matmul %19, %17, %cst_16 {dimension_numbers = #tpu.dot_dimension_numbers<[1], [0], [0], [1], [0, 0, 1, 1], [], []>} : vector<128x128xbf16>, vector<128x256xbf16>, vector<128x256xf32> -> vector<128x256xf32>
    %21 = vector.broadcast %18 : vector<1x256xf32> to vector<128x256xf32>
    %22 = arith.addf %20, %21 : vector<128x256xf32>
    %c0_17 = arith.constant 0 : index
    %c0_18 = arith.constant 0 : index
    %23 = vector.load %arg8[%c0_17, %c0_18] : memref<128x256xf32, #tpu.memory_space<vmem>>, vector<128x256xf32>
    tpu.vector_store %arg8[%c0_17, %c0_18], %22 {strides = array<i32>} : memref<128x256xf32, #tpu.memory_space<vmem>>, vector<128x256xf32>,
    return
  }
  func.func @transform_0(%arg0: i32) -> (i32, i32) {
    %c0_i32 = arith.constant 0 : i32
    %c0_i32_0 = arith.constant 0 : i32
    return %arg0, %c0_i32 : i32, i32
  }
  func.func @transform_1(%arg0: i32) -> (i32, i32) {
    %c0_i32 = arith.constant 0 : i32
    %c0_i32_0 = arith.constant 0 : i32
    %c0_i32_1 = arith.constant 0 : i32
    return %c0_i32, %c0_i32_0 : i32, i32
  }
  func.func @transform_2(%arg0: i32) -> (i32, i32) {
    %c0_i32 = arith.constant 0 : i32
    %c0_i32_0 = arith.constant 0 : i32
    %c0_i32_1 = arith.constant 0 : i32
    return %c0_i32, %c0_i32_0 : i32, i32
  }
  func.func @transform_3(%arg0: i32) -> (i32, i32) {
    %c0_i32 = arith.constant 0 : i32
    %c0_i32_0 = arith.constant 0 : i32
    %c0_i32_1 = arith.constant 0 : i32
    return %c0_i32, %c0_i32_0 : i32, i32
  }
  func.func @transform_4(%arg0: i32) -> (i32, i32) {
    %c0_i32 = arith.constant 0 : i32
    %c0_i32_0 = arith.constant 0 : i32
    %c0_i32_1 = arith.constant 0 : i32
    return %c0_i32, %c0_i32_0 : i32, i32
  }
  func.func @transform_5(%arg0: i32) -> (i32, i32) {
    %c0_i32 = arith.constant 0 : i32
    %c0_i32_0 = arith.constant 0 : i32
    %c0_i32_1 = arith.constant 0 : i32
    return %c0_i32, %c0_i32_0 : i32, i32
  }
  func.func @transform_6(%arg0: i32) -> (i32, i32) {
    %c0_i32 = arith.constant 0 : i32
    %c0_i32_0 = arith.constant 0 : i32
    %c0_i32_1 = arith.constant 0 : i32
    return %c0_i32, %c0_i32_0 : i32, i32
  }
  func.func @transform_7(%arg0: i32) -> (i32, i32) {
    %c0_i32 = arith.constant 0 : i32
    %c0_i32_0 = arith.constant 0 : i32
    return %arg0, %c0_i32 : i32, i32
  }
}

</mosaic_0001>

<bundles_post_ra>
// kernel: tpu_custom_call.1
= control target key start
LH: loop header
LB: loop body
LE: loop exit
PB: predicated region body
PF: predicated region fallthrough
CT: control target
= control target key end

     0   :  { %s1945_s0 = inlined_call_operand.hbm [shape: f32[256,128], index: 0, kind: input, shape index: {}]   ;;  %s1946_s1 = inlined_call_operand.hbm [shape: bf16[128,128], index: 1, kind: input, shape index: {}]   ;;  %s1947_s2 = inlined_call_operand.vmem [shape: f32[1,128], index: 2, kind: input, shape index: {}]   ;;  %s1948_s3 = inlined_call_operand.hbm [shape: bf16[128,128], index: 3, kind: input, shape index: {}]   ;;  %s1949_s4 = inlined_call_operand.vmem [shape: f32[1,128], index: 4, kind: input, shape index: {}]   ;;  %s1950_s5 = inlined_call_operand.hbm [shape: bf16[128,256], index: 5, kind: input, shape index: {}]   ;;  %s1951_s6 = inlined_call_operand.vmem [shape: f32[1,256], index: 6, kind: input, shape index: {}]   ;;  %s1952_s7 = inlined_call_operand.hbm [shape: f32[256,256], index: 7, kind: output, shape index: {}]  }
   0x1   :  { %1959 = sst [smem:[#allocation15_spill]] %s1946_s1 }
   0x2   :  { %12 = vsyncpa [#allocation3], 0 }
   0x3   :  { %14 = vsyncpa [#allocation3 + $0x1], 0 }
   0x4   :  { %15 = vsyncpa [#allocation6], 0 }
   0x5   :  { %16 = vsyncpa [#allocation9], 0 }
   0x6   :  { %17 = vsyncpa [#allocation4], 0 }
   0x7   :  { %19 = vsyncpa [#allocation4 + $0x1], 0  ;;  %s1632_s24 = smov 0   ;;  %s1634_s25 = smov 0  }
   0x8   :  { %s1636_s26 = smov 0   ;;  %s1638_s27 = smov 0  }
   0x9 LB: > { %s1653_s28 = sadd.s32 4294967295, %s1578_s27   ;;  %s1122_s29 = sadd.s32 4294967294, %s1578_s27   ;;  %s1578_s27 = sphi %s1638_s27, %s1982_s27   ;;  %s1574_s26 = sphi %s1636_s26, %s1981_s26   ;;  %s1570_s25 = sphi %s1634_s25, %s1980_s25   ;;  %s1566_s24 = sphi %s1632_s24, %s1979_s24  }
   0xa   : > { %p45_p0 = scmp.ne.s32.totalorder %s1570_s25, %s1566_s24  ;;  %p1953_p1 = scmp.eq.s32.totalorder %s1653_s28, 0 }
   0xb   : > { %p201_p3 = scmp.eq.s32.totalorder %s1122_s29, 1  ;;  %p1123_p5 = scmp.ge.s32.totalorder %s1578_s27, 1 }
   0xc   : > { %p1662_p4 = por %p1953_p1, %p45_p0  ;;  %p208_p7 = scmp.lt.s32.totalorder %s1578_s27, 3 }
   0xd   : > { %p1667_p6 = por %p201_p3, %p45_p0  ;;  %s1580_s10 = smov [#allocation5]  }
   0xe   : > { %s1960_s30 = scalar_select %p1662_p4, 1, 0 }
   0xf   : > { %s1961_s8 = scalar_select %p1667_p6, 1, 0 }
  0x10   : > { %p1672_p8 = pnand %p1123_p5, %p208_p7  ;;  %s220_s11 = sshll.u32 %s1580_s10, 4  ;;  %s221_s11 = int_to_ptr.vmem [resolvable:$true] %s220_s11 }
  0x11   : > { %s1581_s13 = smov [#allocation7]   ;;  %s1582_s15 = smov [#allocation8]  }
  0x12   : > { %s1962_s9 = scalar_select %p1672_p8, 1, 0 }
  0x13   : > { %p1292_p9 = pneg %p1672_p8  ;;  %s236_s14 = sshll.u32 %s1581_s13, 4  ;;  %s237_s14 = int_to_ptr.vmem [resolvable:$true] %s236_s14 }
  0x14   : > { %s252_s16 = sshll.u32 %s1582_s15, 4  ;;  %s1411_s17 = scalar_lea.vmem %s221_s11, 1024  ;;  %s253_s16 = int_to_ptr.vmem [resolvable:$true] %s252_s16 }
  0x15   : > { %p1681_p11 = pnand %p1292_p9, %p1953_p1  ;;  %p1412_p13 = scmp.ne.s32.totalorder %s221_s11, %s1411_s17 }
  0x16   : > { %p1419_p5 = scmp.lt.s32.totalorder %s221_s11, %s221_s11  ;;  %p1420_p7 = scmp.lt.s32.totalorder %s1411_s17, %s1411_s17 }
  0x17   : > { %p1402_p12 = pneg %p1681_p11 }
  0x18   : > { %p1421_p9 = por %p1420_p7, %p1419_p5 }
  0x19   : > { %p1414_p0 = pnand %p1412_p13, %p1402_p12 }
  0x1b   : > { %p1415_p3 = pneg %p1414_p0 }
  0x1d   : > { %p1422_p10 = pnand %p1421_p9, %p1415_p3 }
  0x1f   : > { %1425 = shalt.err (!%p1422_p10)
}
  0x20   : > { %s1583_s18 = smov 64   ;;  %s1584_s19 = smov 4  }
  0x21   : > { %s1964_s1 = sld [smem:[#allocation15_spill]]  ;;  %s1437_s22 = scalar_lea.vmem %s237_s14, 1024 }
  0x22   : > { %p1438_p1 = scmp.ne.s32.totalorder %s237_s14, %s1437_s22  ;;  %p1445_p2 = scmp.lt.s32.totalorder %s237_s14, %s237_s14 }
  0x23   : > { %p1446_p6 = scmp.lt.s32.totalorder %s1437_s22, %s1437_s22 }
  0x24   : > { %p1440_p13 = pnand %p1438_p1, %p1402_p12 }
  0x25   : > { %p1447_p5 = por %p1446_p6, %p1445_p2 }
  0x26   : > { %p1441_p0 = pneg %p1440_p13 }
  0x27   : > { %1295 = dma.hbm_to_vmem [thread:$0]  (!%p1681_p11), %s1964_s1, 1024, %s221_s11, [#allocation6], %s1583_s18, %s1583_s18, %s1584_s19  }
  0x28   : > { %p1448_p3 = pnand %p1447_p5, %p1441_p0 }
  0x2a   : > { %1451 = shalt.err (!%p1448_p3)
}
  0x2b   : > { %1298 = dma.hbm_to_vmem [thread:$0]  (!%p1681_p11), %s1948_s3, 1024, %s237_s14, [#allocation6], %s1583_s18, %s1583_s18, %s1584_s19  }
  0x2c   : > { %s1463_s10 = scalar_lea.vmem %s253_s16, 2048  ;;  %p1471_p9 = scmp.lt.s32.totalorder %s253_s16, %s253_s16 }
  0x2d   : > { %p1464_p10 = scmp.ne.s32.totalorder %s253_s16, %s1463_s10  ;;  %p1472_p13 = scmp.lt.s32.totalorder %s1463_s10, %s1463_s10 }
  0x2f   : > { %p1466_p7 = pnand %p1464_p10, %p1402_p12  ;;  %p1473_p4 = por %p1472_p13, %p1471_p9 }
  0x31   : > { %p1467_p1 = pneg %p1466_p7 }
  0x33   : > { %p1474_p2 = pnand %p1473_p4, %p1467_p1 }
  0x35   : > { %1477 = shalt.err (!%p1474_p2)
}
  0x36   : > { %s1955_s11 = smov 128   ;;  %s1956_s13 = smov 8  }
  0x37   : > { %1301 = dma.hbm_to_vmem [thread:$0]  (!%p1681_p11), %s1950_s5, 2048, %s253_s16, [#allocation9], %s1955_s11, %s1955_s11, %s1956_s13  }
  0x38   : > { %s1715_s17 = sadd.s32 1, %s1578_s27   ;;  %s32_s19 = sadd.s32 1, %s1574_s26 }
  0x39   : > { %s29_s18 = ssub.s32 %s1578_s27, %s1715_s17  ;;  %p39_p6 = scmp.ne.s32.totalorder %s1574_s26, %s1570_s25 }
  0x3a   : > { %p30_p4 = scmp.eq.s32.totalorder %s29_s18, 0  ;;  %p40_p12 = scmp.eq.s32.totalorder %s1578_s27, 0 }
  0x3b   : > { %p1313_p0 = scmp.lt.s32.totalorder %s1578_s27, 2  ;;  %p1965_p3 = scmp.eq.s32.totalorder %s1653_s28, 1 }
  0x3c   : > { %s1725_s20 = scalar_select %p30_p4, %s1574_s26, %s32_s19  }
  0x3d   : > { %p41_p5 = por %p40_p12, %p39_p6  ;;  %p1729_p10 = por %p1965_p3, %p39_p6 }
  0x3e   : > { %s269_s21 = sand.u32 1, %s1574_s26   ;;  %s1177_s22 = sshll.u32 %s1578_s27, 11 }
  0x3f   : > { %s1966_s12 = scalar_select %p1729_p10, 1, 0 }
  0x40   : > { %s1128_s16 = sshll.u32 %s269_s21, 7  ;;  %s1738_s10 = scalar_lea.hbm %s1945_s0, %s1177_s22 }
  0x41   : > { %s273_s14 = scalar_lea.vmem [#allocation2], %s1128_s16  ;;  %p1740_p11 = pnand %p1313_p0, %p41_p5 }
  0x42   : > { %s280_s15 = sshll.u32 %s273_s14, 4  ;;  %s1746_s19 = scalar_lea.sflag [#allocation3], %s269_s21  ;;  %s1744_s15 = int_to_ptr.vmem [resolvable:$true] %s280_s15 }
  0x43   : > { %s1478_s11 = scalar_lea.hbm %s1738_s10, 2048  ;;  %p1480_p1 = pneg %p1740_p11 }
  0x44   : > { %p1479_p7 = scmp.ne.s32.totalorder %s1738_s10, %s1478_s11  ;;  %s1483_s16 = scalar_lea.hbm %s1945_s0, 4096 }
  0x45   : > { %p1484_p2 = scmp.lt.s32.totalorder %s1738_s10, %s1945_s0  ;;  %p1485_p4 = scmp.lt.s32.totalorder %s1483_s16, %s1478_s11 }
  0x46   : > { %p1481_p9 = pnand %p1480_p1, %p1479_p7 }
  0x47   : > { %p1486_p6 = por %p1485_p4, %p1484_p2 }
  0x48   : > { %p1482_p13 = pneg %p1481_p9 }
  0x4a   : > { %p1487_p12 = pnand %p1486_p6, %p1482_p13 }
  0x4c   : > { %1490 = shalt.err (!%p1487_p12)
}
  0x4d   : > { %s1491_s21 = scalar_lea.vmem %s1744_s15, 2048  ;;  %s1587_s13 = smov [#allocation2]  }
  0x4e   : > { %p1492_p0 = scmp.ne.s32.totalorder %s1744_s15, %s1491_s21  ;;  %s1496_s1 = sshll.u32 %s1587_s13, 4  ;;  %s1497_s1 = int_to_ptr.vmem [resolvable:$false] %s1496_s1 }
  0x4f   : > { %s1498_s22 = scalar_lea.vmem %s1497_s1, 4096  ;;  %p1499_p7 = scmp.lt.s32.totalorder %s1744_s15, %s1497_s1 }
  0x50   : > { %p1494_p5 = pnand %p1492_p0, %p1480_p1  ;;  %p1500_p9 = scmp.lt.s32.totalorder %s1498_s22, %s1491_s21 }
  0x52   : > { %p1495_p3 = pneg %p1494_p5  ;;  %p1501_p10 = por %p1500_p9, %p1499_p7 }
  0x54   : > { %p1502_p8 = pnand %p1501_p10, %p1495_p3 }
  0x56   : > { %1505 = shalt.err (!%p1502_p8)
}
  0x57   : > { %s1968_s11 = smov 8   ;;  %s1969_s23 = smov 128  }
  0x58   : > { %1305 = dma.hbm_to_vmem [thread:$0]  (!%p1740_p11), %s1738_s10, 2048, %s1744_s15, %s1746_s19, %s1969_s23, %s1969_s23, %s1968_s11  }
  0x59   : > { %p1970_p1 = scmp.ne.s32.totalorder %s1962_s9, 0 }
  0x5a   : > { %s1773_s13 = sand.u32 (!%p1970_p1), 1, %s1570_s25   ;;  %p1971_p8 = scmp.ne.s32.totalorder (!%p1970_p1), %s1960_s30, 0 }
  0x5b   : > { %292 = sbr.rel (%p1970_p1) target bundleno = 818 (0x332), region = 48  ;;  %s1132_s1 = sshll.u32 (!%p1970_p1), %s1773_s13, 7 }
  0x5c   : > { %s295_s16 = scalar_lea.sflag (!%p1970_p1), [#allocation3], %s1773_s13  ;;  %s1777_s29 = scalar_lea.vmem (!%p1970_p1), [#allocation2], %s1132_s1 }
  0x60   : > { %1549 = dma.done.wait (%p1971_p8), %s295_s16, 2048  }
  0x61   : > { %1551 = vsyncadd (%p1971_p8), %s295_s16, 4294965248  ;;  %p1972_p10 = scmp.eq.s32.totalorder %s1653_s28, 0 }
  0x63   : > { %1553 = dma.done.wait (%p1972_p10), [#allocation6], 2048   ;;  %p1973_p11 = pmov %p1972_p10 }
  0x64   : > { %p1974_p13 = pmov %p1972_p10 }
  0x65   : > { %1555 = vsyncadd (%p1973_p11), [#allocation6], 4294965248 }
  0x66   : > { %1557 = dma.done.wait (%p1974_p13), [#allocation9], 2048   ;;  %p1975_p2 = pmov %p1972_p10 }
  0x67   : > { %v1360_v0 = vld [vmem:[#allocation5 + $0x38] sm:$0xff]   ;;  %v1361_v1 = vld [vmem:[#allocation5 + $0x30] sm:$0xff]   ;;  %v1362_v2 = vld [vmem:[#allocation5 + $0x28] sm:$0xff]   ;;  %s1136_s14 = sshll.u32 %s1773_s13, 8  ;;  %s1179_s22 = sshll.u32 %s1653_s28, 12 }
  0x68   : > { %1559 = vsyncadd (%p1975_p2), [#allocation9], 4294965248  ;;  %1212 = vmatprep.subr.bf16.mxu1 %v1360_v0  ;;  %v1363_v3 = vld [vmem:[#allocation5 + $0x20] sm:$0xff]   ;;  %v345_v5 = vld [vmem:[%s1777_s29 + $0x8] sm:$0xff]  ;;  %s1830_s21 = scalar_lea.vmem [#allocation10], %s1136_s14  ;;  %s1897_s16 = scalar_lea.hbm %s1952_s7, %s1179_s22 }
  0x69   : > { %1213 = vmatpush3.bf16.msra.mxu1 %v1360_v0  ;;  %v344_v4 = vld [vmem:[%s1777_s29] sm:$0xff]  ;;  %v1364_v7 = vld [vmem:[#allocation5 + $0x18] sm:$0xff]   ;;  %v1365_v8 = vld [vmem:[#allocation5 + $0x10] sm:$0xff]   ;;  %s1020_s11 = sshll.u32 %s1830_s21, 4  ;;  %s1006_s28 = scalar_lea.sflag [#allocation4], %s1773_s13  ;;  %s1899_s11 = int_to_ptr.vmem [resolvable:$true] %s1020_s11 }
  0x6a   : > { %1214 = vmatprep.subr.bf16.mxu1 %v1361_v1  ;;  %v377_v6 = vpack.c.bf16 %v345_v5, %v344_v4  ;;  %v1366_v9 = vld [vmem:[#allocation5 + $0x8] sm:$0xff]   ;;  %v1367_v10 = vld [vmem:[#allocation5] sm:$0xff]   ;;  %v346_v11 = vld [vmem:[%s1777_s29 + $0x10] sm:$0xff]  ;;  %p1976_p6 = scmp.ne.s32.totalorder %s1966_s12, 0  ;;  %s1589_s30 = smov [#allocation10]  }
  0x6b   : > { %v347_v12 = vld [vmem:[%s1777_s29 + $0x18] sm:$0xff]  ;;  %v348_v13 = vld [vmem:[%s1777_s29 + $0x20] sm:$0xff]  ;;  %v349_v14 = vld [vmem:[%s1777_s29 + $0x28] sm:$0xff]  ;;  %s1510_s9 = sshll.u32 %s1589_s30, 4  ;;  %s1511_s9 = int_to_ptr.vmem [resolvable:$false] %s1510_s9 }
  0x6c   : > { %1228 = vmatprep.mubr.bf16.mxu1 %v377_v6  ;;  %v1368_v15 = vld [vmem:[#allocation7 + $0x38] sm:$0xff]   ;;  %v378_v16 = vpack.c.bf16 %v347_v12, %v346_v11  ;;  %v379_v17 = vpack.c.bf16 %v349_v14, %v348_v13  ;;  %v1369_v18 = vld [vmem:[#allocation7 + $0x30] sm:$0xff]   ;;  %v352_v21 = vld [vmem:[%s1777_s29 + $0x40] sm:$0xff]  ;;  %s1512_s10 = scalar_lea.vmem %s1511_s9, 8192  ;;  %p1513_p5 = scmp.lt.s32.totalorder %s1899_s11, %s1511_s9 }
  0x6d   : > { %1215 = vmatpush3.bf16.msra.mxu1 %v1361_v1  ;;  %v350_v19 = vld [vmem:[%s1777_s29 + $0x30] sm:$0xff]  ;;  %v351_v20 = vld [vmem:[%s1777_s29 + $0x38] sm:$0xff]  ;;  %v353_v22 = vld [vmem:[%s1777_s29 + $0x48] sm:$0xff] }
  0x6e   : > { %1216 = vmatprep.subr.bf16.mxu1 %v1362_v2  ;;  %v1370_v23 = vld [vmem:[#allocation7 + $0x28] sm:$0xff]   ;;  %v380_v24 = vpack.c.bf16 %v351_v20, %v350_v19  ;;  %v381_v25 = vpack.c.bf16 %v353_v22, %v352_v21  ;;  %v1371_v26 = vld [vmem:[#allocation7 + $0x20] sm:$0xff]   ;;  %v354_v27 = vld [vmem:[%s1777_s29 + $0x50] sm:$0xff] }
  0x6f   : > { %v355_v28 = vld [vmem:[%s1777_s29 + $0x58] sm:$0xff]  ;;  %v356_v29 = vld [vmem:[%s1777_s29 + $0x60] sm:$0xff]  ;;  %v357_v30 = vld [vmem:[%s1777_s29 + $0x68] sm:$0xff] }
  0x70   : > { %v1372_v31 = vld [vmem:[#allocation7 + $0x18] sm:$0xff]   ;;  %v382_v32 = vpack.c.bf16 %v355_v28, %v354_v27  ;;  %v383_v33 = vpack.c.bf16 %v357_v30, %v356_v29  ;;  %v358_v34 = vld [vmem:[%s1777_s29 + $0x70] sm:$0xff]  ;;  %v1374_v38 = vld [vmem:[#allocation7 + $0x8] sm:$0xff]  }
  0x71   : > { %1217 = vmatpush3.bf16.msra.mxu1 %v1362_v2  ;;  %v359_v35 = vld [vmem:[%s1777_s29 + $0x78] sm:$0xff]  ;;  %v1373_v37 = vld [vmem:[#allocation7 + $0x10] sm:$0xff]   ;;  %v1375_v39 = vld [vmem:[#allocation7] sm:$0xff]   ;;  %s1506_s29 = scalar_lea.vmem %s1899_s11, 4096 }
  0x72   : > { %1218 = vmatprep.subr.bf16.mxu1 %v1363_v3  ;;  %v384_v36 = vpack.c.bf16 %v359_v35, %v358_v34  ;;  %v1376_v40 = vld [vmem:[#allocation8 + $0x74] ss:$8 sps:$4 sm:$0xff]   ;;  %v1378_v41 = vld [vmem:[#allocation8 + $0x70] ss:$8 sps:$4 sm:$0xff]   ;;  %v1379_v42 = vld [vmem:[#allocation8 + $0x64] ss:$8 sps:$4 sm:$0xff]   ;;  %p1507_p4 = scmp.ne.s32.totalorder %s1899_s11, %s1506_s29  ;;  %p1514_p3 = scmp.lt.s32.totalorder %s1512_s10, %s1506_s29 }
  0x73   : > { %860 = vmatprep.subr.bf16.mxu0 %v1376_v40  ;;  %v1381_v43 = vld [vmem:[#allocation8 + $0x60] ss:$8 sps:$4 sm:$0xff]   ;;  %v1382_v44 = vld [vmem:[#allocation8 + $0x54] ss:$8 sps:$4 sm:$0xff]   ;;  %v1384_v45 = vld [vmem:[#allocation8 + $0x50] ss:$8 sps:$4 sm:$0xff]  }
  0x74   : > { %861 = vmatpush1.bf16.msra.mxu0 %v1378_v41  ;;  %v1385_v46 = vld [vmem:[#allocation8 + $0x44] ss:$8 sps:$4 sm:$0xff]   ;;  %v1387_v47 = vld [vmem:[#allocation8 + $0x40] ss:$8 sps:$4 sm:$0xff]   ;;  %v1388_v48 = vld [vmem:[#allocation8 + $0x34] ss:$8 sps:$4 sm:$0xff]   ;;  %p1508_p12 = pnand %p1507_p4, %p1976_p6  ;;  %p1515_p7 = por %p1514_p3, %p1513_p5 }
  0x75   : > { %1219 = vmatpush3.bf16.msra.mxu1 %v1363_v3  ;;  %862 = vmatprep.subr.bf16.mxu0 %v1379_v42  ;;  %v1390_v49 = vld [vmem:[#allocation8 + $0x30] ss:$8 sps:$4 sm:$0xff]   ;;  %v1137_v52 = vld [vmem:[%s1947_s2] ss:$0 sm:$0xff] }
  0x76   : > { %1220 = vmatprep.subr.bf16.mxu1 %v1364_v7  ;;  %p1509_p0 = pneg %p1508_p12 }
  0x78   : > { %863 = vmatpush1.bf16.msra.mxu0 %v1381_v43  ;;  %v1391_v43 = vld [vmem:[#allocation8 + $0x24] ss:$8 sps:$4 sm:$0xff]   ;;  %p1516_p9 = pnand %p1515_p7, %p1509_p0 }
  0x79   : > { %1221 = vmatpush3.bf16.msra.mxu1 %v1364_v7  ;;  %864 = vmatprep.subr.bf16.mxu0 %v1382_v44  ;;  %v1393_v44 = vld [vmem:[#allocation8 + $0x20] ss:$8 sps:$4 sm:$0xff]  }
  0x7a   : > { %1222 = vmatprep.subr.bf16.mxu1 %v1365_v8 }
  0x7c   : > { %865 = vmatpush1.bf16.msra.mxu0 %v1384_v45  ;;  %v1394_v45 = vld [vmem:[#allocation8 + $0x14] ss:$8 sps:$4 sm:$0xff]  }
  0x7d   : > { %1223 = vmatpush3.bf16.msra.mxu1 %v1365_v8  ;;  %866 = vmatprep.subr.bf16.mxu0 %v1385_v46  ;;  %v1396_v46 = vld [vmem:[#allocation8 + $0x10] ss:$8 sps:$4 sm:$0xff]  }
  0x7e   : > { %1224 = vmatprep.subr.bf16.mxu1 %v1366_v9 }
  0x80   : > { %867 = vmatpush1.bf16.msra.mxu0 %v1387_v47  ;;  %v1397_v47 = vld [vmem:[#allocation8 + $0x4] ss:$8 sps:$4 sm:$0xff]  }
  0x81   : > { %1225 = vmatpush3.bf16.msra.mxu1 %v1366_v9  ;;  %868 = vmatprep.subr.bf16.mxu0 %v1388_v48  ;;  %v1399_v48 = vld [vmem:[#allocation8] ss:$8 sps:$4 sm:$0xff]  }
  0x82   : > { %1226 = vmatprep.subr.bf16.mxu1 %v1367_v10 }
  0x84   : > { %869 = vmatpush1.bf16.msra.mxu0 %v1390_v49  ;;  %v1588_v49 = vmov 0  }
  0x85   : > { %1227 = vmatpush3.bf16.msra.mxu1 %v1367_v10  ;;  %870 = vmatprep.subr.bf16.mxu0 %v1391_v43  ;;  %v770_v43 = vlaneseq }
  0x86   : > { %1244 = vmatprep.subr.bf16.mxu1 %v1368_v15  ;;  %892 = vmatprep.mubr.bf16.mxu0 %v1588_v49 }
  0x88   : > { %1229 = vmatmul.mubr.bf16.vlgmr.msra.gmra.mxu1 %v378_v16  ;;  %871 = vmatpush1.bf16.msra.mxu0 %v1393_v44  ;;  %v771_v44 = vshrl.u32 %v770_v43, 7 }
  0x89   : > { %1232 = vmatprep.mubr.bf16.mxu1 %v379_v17  ;;  %1245 = vmatpush3.bf16.msra.mxu1 %v1368_v15 }
  0x8a   : > { %1246 = vmatprep.subr.bf16.mxu1 %v1369_v18  ;;  %872 = vmatprep.subr.bf16.mxu0 %v1394_v45  ;;  %v772_v45 = vsub.s32 0, %v771_v44 }
  0x8c   : > { %873 = vmatpush1.bf16.msra.mxu0 %v1396_v46  ;;  %v760_v46 = vld [vmem:[%s1951_s6] sm:$0x3] }
  0x8d   : > { %1247 = vmatpush3.bf16.msra.mxu1 %v1369_v18  ;;  %874 = vmatprep.subr.bf16.mxu0 %v1397_v47  ;;  %v776_v47 = vsub.s32 1, %v771_v44 }
  0x8e   : > { %1248 = vmatprep.subr.bf16.mxu1 %v1370_v23 }
  0x90   : > { %1233 = vmatmul.mubr.bf16.gmra.mxu1 %v380_v24  ;;  %875 = vmatpush1.bf16.msra.mxu0 %v1399_v48  ;;  %v1825_v48 = vrot.slane %v760_v46, %v772_v45 }
  0x91   : > { %1236 = vmatprep.mubr.bf16.mxu1 %v381_v25  ;;  %1249 = vmatpush3.bf16.msra.mxu1 %v1370_v23 }
  0x92   : > { %1250 = vmatprep.subr.bf16.mxu1 %v1371_v26 }
  0x95   : > { %1251 = vmatpush3.bf16.msra.mxu1 %v1371_v26 }
  0x96   : > { %1252 = vmatprep.subr.bf16.mxu1 %v1372_v31 }
  0x98   : > { %1237 = vmatmul.mubr.bf16.gmra.mxu1 %v382_v32 }
  0x99   : > { %1240 = vmatprep.mubr.bf16.mxu1 %v383_v33  ;;  %1253 = vmatpush3.bf16.msra.mxu1 %v1372_v31 }
  0x9a   : > { %1254 = vmatprep.subr.bf16.mxu1 %v1373_v37 }
  0x9d   : > { %1255 = vmatpush3.bf16.msra.mxu1 %v1373_v37 }
  0x9e   : > { %1256 = vmatprep.subr.bf16.mxu1 %v1374_v38 }
  0xa0   : > { %1241 = vmatmul.mubr.bf16.gmra.mxu1 %v384_v36 }
  0xa1   : > { %1257 = vmatpush3.bf16.msra.mxu1 %v1374_v38 }
  0xa2   : > { %1258 = vmatprep.subr.bf16.mxu1 %v1375_v39 }
  0xa5   : > { %1259 = vmatpush3.bf16.msra.mxu1 %v1375_v39 }
 0x148   : > { %v1230_v50 = vpop.f32.mrf.mxu1 }
 0x149   : > { %v482_v56 = vadd.f32 %v1230_v50, %v1137_v52 }
 0x14a   : > { %v473_v51 = vpop.f32.mrf.mxu1 }
 0x14b   : > { %v474_v54 = vadd.f32 %v1137_v52, %v473_v51  ;;  %v538_v63 = vmax.f32 %v482_v56, 0.0 }
 0x14c   : > { %v1231_v53 = vpop.f32.mrf.mxu1 }
 0x14d   : > { %v485_v55 = vadd.f32 %v1231_v53, %v1137_v52  ;;  %v536_v61 = vmax.f32 %v474_v54, 0.0 }
 0x14e   : > { %v476_v57 = vpop.f32.mrf.mxu1 }
 0x14f   : > { %v477_v58 = vadd.f32 %v1137_v52, %v476_v57  ;;  %v539_v59 = vmax.f32 %v485_v55, 0.0 }
 0x150   : > { %v1234_v60 = vpop.f32.mrf.mxu1 }
 0x151   : > { %v537_v62 = vmax.f32 %v477_v58, 0.0  ;;  %v498_v0 = vadd.f32 %v1234_v60, %v1137_v52  ;;  %v570_v4 = vpack.c.bf16 %v539_v59, %v538_v63 }
 0x152   : > { %v489_v1 = vpop.f32.mrf.mxu1 }
 0x153   : > { %v569_v2 = vpack.c.bf16 %v537_v62, %v536_v61  ;;  %v490_v3 = vadd.f32 %v1137_v52, %v489_v1  ;;  %v542_v7 = vmax.f32 %v498_v0, 0.0 }
 0x154   : > { %v1235_v5 = vpop.f32.mrf.mxu1 }
 0x155   : > { %v501_v6 = vadd.f32 %v1235_v5, %v1137_v52  ;;  %1260 = vmatprep.mubr.bf16.mxu1 %v569_v2  ;;  %v540_v9 = vmax.f32 %v490_v3, 0.0 }
 0x156   : > { %v492_v8 = vpop.f32.mrf.mxu1  ;;  %1261 = vmatmul.mubr.bf16.vlgmr.msra.gmra.mxu1 %v570_v4 }
 0x157   : > { %v543_v10 = vmax.f32 %v501_v6, 0.0  ;;  %v493_v11 = vadd.f32 %v1137_v52, %v492_v8 }
 0x158   : > { %v1238_v12 = vpop.f32.mrf.mxu1 }
 0x159   : > { %v541_v13 = vmax.f32 %v493_v11, 0.0  ;;  %v572_v14 = vpack.c.bf16 %v543_v10, %v542_v7  ;;  %v514_v15 = vadd.f32 %v1238_v12, %v1137_v52 }
 0x15a   : > { %v505_v16 = vpop.f32.mrf.mxu1 }
 0x15b   : > { %v571_v17 = vpack.c.bf16 %v541_v13, %v540_v9  ;;  %v506_v18 = vadd.f32 %v1137_v52, %v505_v16  ;;  %v546_v21 = vmax.f32 %v514_v15, 0.0 }
 0x15c   : > { %v1239_v19 = vpop.f32.mrf.mxu1 }
 0x15d   : > { %1264 = vmatprep.mubr.bf16.mxu1 %v571_v17  ;;  %v517_v20 = vadd.f32 %v1239_v19, %v1137_v52  ;;  %v544_v23 = vmax.f32 %v506_v18, 0.0 }
 0x15e   : > { %1265 = vmatmul.mubr.bf16.gmra.mxu1 %v572_v14  ;;  %v508_v22 = vpop.f32.mrf.mxu1 }
 0x15f   : > { %v547_v24 = vmax.f32 %v517_v20, 0.0  ;;  %v509_v25 = vadd.f32 %v1137_v52, %v508_v22 }
 0x160   : > { %v1242_v26 = vpop.f32.mrf.mxu1 }
 0x161   : > { %v545_v27 = vmax.f32 %v509_v25, 0.0  ;;  %v574_v28 = vpack.c.bf16 %v547_v24, %v546_v21  ;;  %v530_v29 = vadd.f32 %v1242_v26, %v1137_v52 }
 0x162   : > { %v521_v30 = vpop.f32.mrf.mxu1 }
 0x163   : > { %v573_v31 = vpack.c.bf16 %v545_v27, %v544_v23  ;;  %v522_v32 = vadd.f32 %v1137_v52, %v521_v30  ;;  %v550_v35 = vmax.f32 %v530_v29, 0.0 }
 0x164   : > { %v1243_v33 = vpop.f32.mrf.mxu1 }
 0x165   : > { %1268 = vmatprep.mubr.bf16.mxu1 %v573_v31  ;;  %v533_v34 = vadd.f32 %v1243_v33, %v1137_v52  ;;  %v548_v37 = vmax.f32 %v522_v32, 0.0 }
 0x166   : > { %1269 = vmatmul.mubr.bf16.gmra.mxu1 %v574_v28  ;;  %v524_v36 = vpop.f32.mrf.mxu1 }
 0x167   : > { %v551_v38 = vmax.f32 %v533_v34, 0.0  ;;  %v525_v39 = vadd.f32 %v1137_v52, %v524_v36  ;;  %v1146_v52 = vld [vmem:[%s1949_s4] ss:$0 sm:$0xff] }
 0x169   : > { %v549_v40 = vmax.f32 %v525_v39, 0.0  ;;  %v576_v41 = vpack.c.bf16 %v551_v38, %v550_v35 }
 0x16b   : > { %v575_v42 = vpack.c.bf16 %v549_v40, %v548_v37 }
 0x16d   : > { %1272 = vmatprep.mubr.bf16.mxu1 %v575_v42 }
 0x16e   : > { %1273 = vmatmul.mubr.bf16.gmra.mxu1 %v576_v41 }
 0x216   : > { %v1262_v50 = vpop.f32.mrf.mxu1 }
 0x217   : > { %v674_v0 = vadd.f32 %v1262_v50, %v1146_v52  ;;  %v1827_v50 = vrot.slane %v760_v46, %v776_v47 }
 0x218   : > { %v665_v51 = vpop.f32.mrf.mxu1 }
 0x219   : > { %v666_v54 = vadd.f32 %v1146_v52, %v665_v51  ;;  %v730_v3 = vmax.f32 %v674_v0, 0.0 }
 0x21a   : > { %v1263_v53 = vpop.f32.mrf.mxu1 }
 0x21b   : > { %v728_v58 = vmax.f32 %v666_v54, 0.0  ;;  %v677_v61 = vadd.f32 %v1263_v53, %v1146_v52 }
 0x21c   : > { %v668_v55 = vpop.f32.mrf.mxu1 }
 0x21d   : > { %v669_v56 = vadd.f32 %v1146_v52, %v668_v55  ;;  %v731_v1 = vmax.f32 %v677_v61, 0.0 }
 0x21e   : > { %v1266_v57 = vpop.f32.mrf.mxu1 }
 0x21f   : > { %v729_v59 = vmax.f32 %v669_v56, 0.0  ;;  %v762_v4 = vpack.c.bf16 %v731_v1, %v730_v3  ;;  %v690_v14 = vadd.f32 %v1266_v57, %v1146_v52 }
 0x220   : > { %v681_v60 = vpop.f32.mrf.mxu1 }
 0x221   : > { %v761_v62 = vpack.c.bf16 %v729_v59, %v728_v58  ;;  %v682_v7 = vadd.f32 %v1146_v52, %v681_v60  ;;  %v734_v17 = vmax.f32 %v690_v14, 0.0 }
 0x222   : > { %v1267_v63 = vpop.f32.mrf.mxu1 }
 0x223   : > { %893 = vmatmul.mubr.bf16.vlgmr.msra.gmra.mxu0 %v761_v62  ;;  %v732_v10 = vmax.f32 %v682_v7, 0.0  ;;  %v693_v11 = vadd.f32 %v1267_v63, %v1146_v52 }
 0x224   : > { %902 = vmatprep.mubr.bf16.mxu0 %v1588_v49  ;;  %v684_v2 = vpop.f32.mrf.mxu1 }
 0x225   : > { %v685_v5 = vadd.f32 %v1146_v52, %v684_v2  ;;  %v735_v15 = vmax.f32 %v693_v11, 0.0 }
 0x226   : > { %v1270_v6 = vpop.f32.mrf.mxu1 }
 0x227   : > { %v733_v8 = vmax.f32 %v685_v5, 0.0  ;;  %v764_v18 = vpack.c.bf16 %v735_v15, %v734_v17  ;;  %v706_v25 = vadd.f32 %v1270_v6, %v1146_v52 }
 0x228   : > { %v697_v9 = vpop.f32.mrf.mxu1 }
 0x229   : > { %v763_v12 = vpack.c.bf16 %v733_v8, %v732_v10  ;;  %v698_v19 = vadd.f32 %v1146_v52, %v697_v9  ;;  %v738_v29 = vmax.f32 %v706_v25, 0.0 }
 0x22a   : > { %v1271_v13 = vpop.f32.mrf.mxu1 }
 0x22b   : > { %903 = vmatmul.mubr.bf16.gmra.mxu0 %v762_v4  ;;  %v736_v22 = vmax.f32 %v698_v19, 0.0  ;;  %v709_v26 = vadd.f32 %v1271_v13, %v1146_v52 }
 0x22c   : > { %912 = vmatprep.mubr.bf16.mxu0 %v1588_v49  ;;  %v700_v16 = vpop.f32.mrf.mxu1 }
 0x22d   : > { %v701_v20 = vadd.f32 %v1146_v52, %v700_v16  ;;  %v739_v30 = vmax.f32 %v709_v26, 0.0 }
 0x22e   : > { %v1274_v21 = vpop.f32.mrf.mxu1 }
 0x22f   : > { %v737_v23 = vmax.f32 %v701_v20, 0.0  ;;  %v766_v32 = vpack.c.bf16 %v739_v30, %v738_v29  ;;  %v722_v37 = vadd.f32 %v1274_v21, %v1146_v52 }
 0x230   : > { %v713_v24 = vpop.f32.mrf.mxu1 }
 0x231   : > { %v765_v27 = vpack.c.bf16 %v737_v23, %v736_v22  ;;  %v714_v33 = vadd.f32 %v1146_v52, %v713_v24  ;;  %v742_v40 = vmax.f32 %v722_v37, 0.0 }
 0x232   : > { %v1275_v28 = vpop.f32.mrf.mxu1 }
 0x233   : > { %913 = vmatmul.mubr.bf16.gmra.mxu0 %v763_v12  ;;  %v740_v35 = vmax.f32 %v714_v33, 0.0  ;;  %v725_v38 = vadd.f32 %v1275_v28, %v1146_v52 }
 0x234   : > { %922 = vmatprep.mubr.bf16.mxu0 %v1588_v49  ;;  %v716_v31 = vpop.f32.mrf.mxu1 }
 0x235   : > { %v717_v34 = vadd.f32 %v1146_v52, %v716_v31  ;;  %v743_v41 = vmax.f32 %v725_v38, 0.0 }
 0x237   : > { %v741_v36 = vmax.f32 %v717_v34, 0.0  ;;  %v768_v42 = vpack.c.bf16 %v743_v41, %v742_v40 }
 0x239   : > { %v767_v39 = vpack.c.bf16 %v741_v36, %v740_v35 }
 0x23b   : > { %923 = vmatmul.mubr.bf16.gmra.mxu0 %v764_v18 }
 0x23c   : > { %932 = vmatprep.mubr.bf16.mxu0 %v1588_v49 }
 0x243   : > { %933 = vmatmul.mubr.bf16.gmra.mxu0 %v765_v27 }
 0x244   : > { %942 = vmatprep.mubr.bf16.mxu0 %v1588_v49 }
 0x24b   : > { %943 = vmatmul.mubr.bf16.gmra.mxu0 %v766_v32 }
 0x24c   : > { %952 = vmatprep.mubr.bf16.mxu0 %v1588_v49 }
 0x253   : > { %953 = vmatmul.mubr.bf16.gmra.mxu0 %v767_v39 }
 0x254   : > { %962 = vmatprep.mubr.bf16.mxu0 %v1588_v49 }
 0x25b   : > { %963 = vmatmul.mubr.bf16.gmra.mxu0 %v768_v42 }
 0x2e3   : > { %v894_v51 = vpop.f32.mrf.mxu0 }
 0x2e4   : > { %v895_v49 = vadd.f32 %v894_v51, %v1825_v48 }
 0x2e5   : > { %v896_v52 = vpop.f32.mrf.mxu0 }
 0x2e6   : > { %973 = vst [vmem:[%s1830_s21] sm:$0xff] %v895_v49  ;;  %v897_v53 = vadd.f32 %v896_v52, %v1827_v50 }
 0x2e7   : > { %v898_v54 = vpop.f32.mrf.mxu0 }
 0x2e8   : > { %974 = vst [vmem:[%s1830_s21 + $0x8] sm:$0xff] %v897_v53  ;;  %v899_v55 = vadd.f32 %v898_v54, %v1825_v48 }
 0x2e9   : > { %v900_v56 = vpop.f32.mrf.mxu0 }
 0x2ea   : > { %975 = vst [vmem:[%s1830_s21 + $0x10] sm:$0xff] %v899_v55  ;;  %v901_v57 = vadd.f32 %v900_v56, %v1827_v50 }
 0x2eb   : > { %v904_v58 = vpop.f32.mrf.mxu0 }
 0x2ec   : > { %976 = vst [vmem:[%s1830_s21 + $0x18] sm:$0xff] %v901_v57  ;;  %v905_v59 = vadd.f32 %v904_v58, %v1825_v48 }
 0x2ed   : > { %v906_v60 = vpop.f32.mrf.mxu0 }
 0x2ee   : > { %977 = vst [vmem:[%s1830_s21 + $0x20] sm:$0xff] %v905_v59  ;;  %v907_v61 = vadd.f32 %v906_v60, %v1827_v50 }
 0x2ef   : > { %v908_v62 = vpop.f32.mrf.mxu0 }
 0x2f0   : > { %978 = vst [vmem:[%s1830_s21 + $0x28] sm:$0xff] %v907_v61  ;;  %v909_v63 = vadd.f32 %v908_v62, %v1825_v48 }
 0x2f1   : > { %v910_v0 = vpop.f32.mrf.mxu0 }
 0x2f2   : > { %979 = vst [vmem:[%s1830_s21 + $0x30] sm:$0xff] %v909_v63  ;;  %v911_v1 = vadd.f32 %v910_v0, %v1827_v50 }
 0x2f3   : > { %v914_v2 = vpop.f32.mrf.mxu0 }
 0x2f4   : > { %980 = vst [vmem:[%s1830_s21 + $0x38] sm:$0xff] %v911_v1  ;;  %v915_v3 = vadd.f32 %v914_v2, %v1825_v48 }
 0x2f5   : > { %v916_v4 = vpop.f32.mrf.mxu0 }
 0x2f6   : > { %981 = vst [vmem:[%s1830_s21 + $0x40] sm:$0xff] %v915_v3  ;;  %v917_v5 = vadd.f32 %v916_v4, %v1827_v50 }
 0x2f7   : > { %v918_v6 = vpop.f32.mrf.mxu0 }
 0x2f8   : > { %982 = vst [vmem:[%s1830_s21 + $0x48] sm:$0xff] %v917_v5  ;;  %v919_v7 = vadd.f32 %v918_v6, %v1825_v48 }
 0x2f9   : > { %v920_v8 = vpop.f32.mrf.mxu0 }
 0x2fa   : > { %983 = vst [vmem:[%s1830_s21 + $0x50] sm:$0xff] %v919_v7  ;;  %v921_v9 = vadd.f32 %v920_v8, %v1827_v50 }
 0x2fb   : > { %v924_v10 = vpop.f32.mrf.mxu0 }
 0x2fc   : > { %984 = vst [vmem:[%s1830_s21 + $0x58] sm:$0xff] %v921_v9  ;;  %v925_v11 = vadd.f32 %v924_v10, %v1825_v48 }
 0x2fd   : > { %v926_v12 = vpop.f32.mrf.mxu0 }
 0x2fe   : > { %985 = vst [vmem:[%s1830_s21 + $0x60] sm:$0xff] %v925_v11  ;;  %v927_v13 = vadd.f32 %v926_v12, %v1827_v50 }
 0x2ff   : > { %v928_v14 = vpop.f32.mrf.mxu0 }
 0x300   : > { %986 = vst [vmem:[%s1830_s21 + $0x68] sm:$0xff] %v927_v13  ;;  %v929_v15 = vadd.f32 %v928_v14, %v1825_v48 }
 0x301   : > { %v930_v16 = vpop.f32.mrf.mxu0 }
 0x302   : > { %987 = vst [vmem:[%s1830_s21 + $0x70] sm:$0xff] %v929_v15  ;;  %v931_v17 = vadd.f32 %v930_v16, %v1827_v50 }
 0x303   : > { %v934_v18 = vpop.f32.mrf.mxu0 }
 0x304   : > { %988 = vst [vmem:[%s1830_s21 + $0x78] sm:$0xff] %v931_v17  ;;  %v935_v19 = vadd.f32 %v934_v18, %v1825_v48 }
 0x305   : > { %v936_v20 = vpop.f32.mrf.mxu0 }
 0x306   : > { %989 = vst [vmem:[%s1830_s21 + $0x80] sm:$0xff] %v935_v19  ;;  %v937_v21 = vadd.f32 %v936_v20, %v1827_v50 }
 0x307   : > { %v938_v22 = vpop.f32.mrf.mxu0 }
 0x308   : > { %990 = vst [vmem:[%s1830_s21 + $0x88] sm:$0xff] %v937_v21  ;;  %v939_v23 = vadd.f32 %v938_v22, %v1825_v48 }
 0x309   : > { %v940_v24 = vpop.f32.mrf.mxu0 }
 0x30a   : > { %991 = vst [vmem:[%s1830_s21 + $0x90] sm:$0xff] %v939_v23  ;;  %v941_v25 = vadd.f32 %v940_v24, %v1827_v50 }
 0x30b   : > { %v944_v26 = vpop.f32.mrf.mxu0 }
 0x30c   : > { %992 = vst [vmem:[%s1830_s21 + $0x98] sm:$0xff] %v941_v25  ;;  %v945_v27 = vadd.f32 %v944_v26, %v1825_v48 }
 0x30d   : > { %v946_v28 = vpop.f32.mrf.mxu0 }
 0x30e   : > { %993 = vst [vmem:[%s1830_s21 + $0xa0] sm:$0xff] %v945_v27  ;;  %v947_v29 = vadd.f32 %v946_v28, %v1827_v50 }
 0x30f   : > { %v948_v30 = vpop.f32.mrf.mxu0 }
 0x310   : > { %994 = vst [vmem:[%s1830_s21 + $0xa8] sm:$0xff] %v947_v29  ;;  %v949_v31 = vadd.f32 %v948_v30, %v1825_v48 }
 0x311   : > { %v950_v32 = vpop.f32.mrf.mxu0 }
 0x312   : > { %995 = vst [vmem:[%s1830_s21 + $0xb0] sm:$0xff] %v949_v31  ;;  %v951_v33 = vadd.f32 %v950_v32, %v1827_v50 }
 0x313   : > { %v954_v34 = vpop.f32.mrf.mxu0 }
 0x314   : > { %996 = vst [vmem:[%s1830_s21 + $0xb8] sm:$0xff] %v951_v33  ;;  %v955_v35 = vadd.f32 %v954_v34, %v1825_v48 }
 0x315   : > { %v956_v36 = vpop.f32.mrf.mxu0 }
 0x316   : > { %997 = vst [vmem:[%s1830_s21 + $0xc0] sm:$0xff] %v955_v35  ;;  %v957_v37 = vadd.f32 %v956_v36, %v1827_v50 }
 0x317   : > { %v958_v38 = vpop.f32.mrf.mxu0 }
 0x318   : > { %998 = vst [vmem:[%s1830_s21 + $0xc8] sm:$0xff] %v957_v37  ;;  %v959_v39 = vadd.f32 %v958_v38, %v1825_v48 }
 0x319   : > { %v960_v40 = vpop.f32.mrf.mxu0 }
 0x31a   : > { %999 = vst [vmem:[%s1830_s21 + $0xd0] sm:$0xff] %v959_v39  ;;  %v961_v41 = vadd.f32 %v960_v40, %v1827_v50 }
 0x31b   : > { %v964_v42 = vpop.f32.mrf.mxu0 }
 0x31c   : > { %1000 = vst [vmem:[%s1830_s21 + $0xd8] sm:$0xff] %v961_v41  ;;  %v965_v43 = vadd.f32 %v964_v42, %v1825_v48 }
 0x31d   : > { %v966_v44 = vpop.f32.mrf.mxu0 }
 0x31e   : > { %1001 = vst [vmem:[%s1830_s21 + $0xe0] sm:$0xff] %v965_v43  ;;  %v967_v45 = vadd.f32 %v966_v44, %v1827_v50 }
 0x31f   : > { %v968_v46 = vpop.f32.mrf.mxu0 }
 0x320   : > { %1002 = vst [vmem:[%s1830_s21 + $0xe8] sm:$0xff] %v967_v45  ;;  %v969_v47 = vadd.f32 %v968_v46, %v1825_v48 }
 0x321   : > { %v970_v51 = vpop.f32.mrf.mxu0 }
 0x322   : > { %1003 = vst [vmem:[%s1830_s21 + $0xf0] sm:$0xff] %v969_v47  ;;  %v971_v49 = vadd.f32 %v970_v51, %v1827_v50 }
 0x324   : > { %1004 = vst [vmem:[%s1830_s21 + $0xf8] sm:$0xff] %v971_v49 }
 0x325   : > { %1519 = shalt.err (!%p1516_p9)
}
 0x326   : > { %s1520_s15 = scalar_lea.hbm %s1897_s16, 4096  ;;  %s1524_s14 = scalar_lea.hbm %s1952_s7, 8192 }
 0x327   : > { %p1521_p1 = scmp.ne.s32.totalorder %s1897_s16, %s1520_s15  ;;  %p1525_p11 = scmp.lt.s32.totalorder %s1897_s16, %s1952_s7 }
 0x328   : > { %p1526_p13 = scmp.lt.s32.totalorder %s1524_s14, %s1520_s15 }
 0x329   : > { %p1522_p8 = pnand %p1521_p1, %p1976_p6 }
 0x32a   : > { %p1527_p2 = por %p1526_p13, %p1525_p11 }
 0x32b   : > { %p1523_p10 = pneg %p1522_p8 }
 0x32d   : > { %p1528_p4 = pnand %p1527_p2, %p1523_p10 }
 0x32f   : > { %1531 = shalt.err (!%p1528_p4)
}
 0x330   : > { %s1590_s23 = smov 256   ;;  %s1591_s1 = smov 16  }
 0x331   : > { %1290 = dma.vmem_to_hbm [thread:$0]  (%p1976_p6), %s1899_s11, 4096, %s1897_s16, %s1006_s28, %s1590_s23, %s1590_s23, %s1591_s1  }
 0x332 PF: > { %s1035_s29 = sand.u32 1, %s1566_s24   ;;  %p1977_p12 = scmp.ne.s32.totalorder %s1961_s8, 0 }
 0x333   : > { %p1978_p0 = scmp.ge.s32.totalorder %s1578_s27, 2  ;;  %s1036_s30 = scalar_lea.sflag [#allocation4], %s1035_s29 }
 0x335   : > { %p1307_p5 = pnand %p1978_p0, %p1977_p12 }
 0x337   : > { %p1308_p3 = pneg %p1307_p5 }
 0x339   : > { %1561 = dma.done.wait (%p1308_p3), %s1036_s30, 4096  }
 0x33a   : > { %1563 = vsyncadd (%p1308_p3), %s1036_s30, 4294963200  ;;  %p22_p7 = scmp.ge.s32.totalorder %s1715_s17, 4   ;;  %s1979_s24 = smov %s1570_s25 }
 0x33b   : > { %s1980_s25 = smov %s1574_s26  ;;  %s1981_s26 = smov %s1725_s20 }
 0x33c   : > { %s1982_s27 = smov %s1715_s17  ;;  %24 = sbr.rel (!%p22_p7) target bundleno = 9 (0x9), region = 105 }
 0x341   :  { %1041 = vsyncpa [#allocation3], 1 }
 0x342   :  { %1043 = vsyncpa [#allocation3 + $0x1], 1 }
 0x343   :  { %1044 = vsyncpa [#allocation6], 1 }
 0x344   :  { %1045 = vsyncpa [#allocation9], 1 }
 0x345   :  { %1046 = vsyncpa [#allocation4], 1 }
 0x346   :  { %1048 = vsyncpa [#allocation4 + $0x1], 1 }

</bundles_post_ra>
